<compile_context>
chip_gen: v5e
topology: v5e:2x2
jax: 0.10.0
libtpu: 0.0.40
codegen_flags: <defaults>
</compile_context>

<pallas_src>
import functools
import math

import jax
import jax.numpy as jnp
import numpy as np
from jax.experimental import pallas as pl
from jax.experimental.pallas import tpu as pltpu


@functools.lru_cache(maxsize=1)
def _vmem_limit_bytes():
    """Per-chip scoped-VMEM limit.  v7x has only 64 MiB/TC -> stay <= 48 MiB;
    v5e has 128 MiB but the weakest HBM/MXU -> give the pipeline more room."""
    try:
        kind = jax.devices()[0].device_kind.lower()
    except Exception:
        return 48 * 1024 * 1024
    if "v5 lite" in kind or "v5e" in kind:
        return 96 * 1024 * 1024
    if "v6" in kind:
        return 64 * 1024 * 1024
    return 48 * 1024 * 1024


def _pick_tile(dim, candidates):
    """Largest candidate that evenly divides `dim`, else the full dim.

    Candidates are multiples of (8, 128) so the (8,128) block constraint holds;
    the full-dim fallback uses the 'equal the full array dims' escape hatch.
    """
    for c in candidates:
        if dim >= c and dim % c == 0:
            return c
    return dim


# ----------------------------------------------------------------------------
# Tiled linear kernel:  o = x @ w + b    (operands optionally cast for the MXU)
# ----------------------------------------------------------------------------
def _linear_kernel(x_ref, w_ref, b_ref, o_ref, acc_ref, *, compute_dtype):
    k = pl.program_id(2)

    @pl.when(k == 0)
    def _():
        acc_ref[...] = jnp.zeros(acc_ref.shape, acc_ref.dtype)

    acc_ref[...] += jnp.dot(x_ref[...].astype(compute_dtype),
                            w_ref[...].astype(compute_dtype),
                            preferred_element_type=jnp.float32)

    # Bias add + cast only once, on the final reduction step.
    @pl.when(k == pl.num_programs(2) - 1)
    def _():
        o_ref[...] = (acc_ref[...] + b_ref[...].astype(jnp.float32)).astype(o_ref.dtype)


def pallas_linear(x2d, w_t, bias, *, compute_dtype=None, out_dtype=None):
    """x2d: (M, K), w_t: (K, N) (pre-transposed weight), bias: (N,)."""
    M, K = x2d.shape
    K2, N = w_t.shape
    assert K == K2
    compute_dtype = compute_dtype if compute_dtype is not None else x2d.dtype
    out_dtype = out_dtype if out_dtype is not None else x2d.dtype

    tm = _pick_tile(M, (512, 256, 128))
    tn = _pick_tile(N, (512, 256, 128))
    tk = _pick_tile(K, (1024, 512, 256, 128))
    b2d = bias.reshape(1, N)

    kernel = functools.partial(_linear_kernel, compute_dtype=compute_dtype)
    return pl.pallas_call(
        kernel,
        out_shape=jax.ShapeDtypeStruct((M, N), out_dtype),
        grid_spec=pltpu.PrefetchScalarGridSpec(
            num_scalar_prefetch=0,
            grid=(M // tm, N // tn, K // tk),
            in_specs=[
                pl.BlockSpec((tm, tk), lambda i, j, k: (i, k)),
                pl.BlockSpec((tk, tn), lambda i, j, k: (k, j)),
                pl.BlockSpec((1, tn), lambda i, j, k: (0, j)),
            ],
            out_specs=pl.BlockSpec((tm, tn), lambda i, j, k: (i, j)),
            scratch_shapes=[pltpu.VMEM((tm, tn), jnp.float32)],
        ),
        compiler_params=pltpu.CompilerParams(
            dimension_semantics=("parallel", "parallel", "arbitrary"),
            vmem_limit_bytes=_vmem_limit_bytes(),
        ),
    )(x2d, w_t, b2d)


# ----------------------------------------------------------------------------
# Flash-style scaled dot-product attention, all heads per block, no relayouts.
# ----------------------------------------------------------------------------
def _flash_mha_kernel(q_ref, k_ref, v_ref, o_ref, m_sc, l_sc, acc_sc,
                      *, h, d_k, compute_dtype):
    """One (batch, q-tile, kv-tile) grid step; all h heads handled inside.

    q_ref/k_ref/v_ref blocks are (1, tq|tkv, d_model) slices of the projection
    outputs in their natural layout (head hh = columns [hh*d_k, (hh+1)*d_k)).
    The 1/sqrt(d_k) scale is already folded into the Q projection weights.
    """
    kv_step = pl.program_id(2)

    @pl.when(kv_step == 0)
    def _():
        m_sc[...] = jnp.full(m_sc.shape, -jnp.inf, m_sc.dtype)
        l_sc[...] = jnp.zeros(l_sc.shape, l_sc.dtype)
        acc_sc[...] = jnp.zeros(acc_sc.shape, acc_sc.dtype)

    for hh in range(h):                      # static trace-time unroll over heads
        col = pl.ds(hh * d_k, d_k)
        qh = q_ref[0, :, col].astype(compute_dtype)   # (tq,  d_k)
        kh = k_ref[0, :, col].astype(compute_dtype)   # (tkv, d_k)
        vh = v_ref[0, :, col].astype(compute_dtype)   # (tkv, d_k)

        # q @ k^T contracting the last dim of both operands (no K transpose).
        s = jax.lax.dot_general(qh, kh, (((1,), (1,)), ((), ())),
                                preferred_element_type=jnp.float32)   # (tq, tkv)

        m_prev = m_sc[hh]                                             # (tq, 128)
        m_new = jnp.maximum(m_prev, jnp.max(s, axis=-1, keepdims=True))
        alpha = jnp.exp(m_prev - m_new)                               # (tq, 128)
        p = jnp.exp(s - m_new[:, 0:1])                                # (tq, tkv)
        l_sc[hh] = alpha * l_sc[hh] + jnp.sum(p, axis=-1, keepdims=True)
        m_sc[hh] = m_new

        pv = jnp.dot(p.astype(compute_dtype), vh,
                     preferred_element_type=jnp.float32)              # (tq, d_k)
        acc_sc[:, col] = alpha[:, 0:1] * acc_sc[:, col] + pv

    @pl.when(kv_step == pl.num_programs(2) - 1)
    def _():
        for hh in range(h):
            col = pl.ds(hh * d_k, d_k)
            l = l_sc[hh][:, 0:1]                          # (tq, 1)
            r = pl.reciprocal(l, approx=True)             # EUP slot
            r = r * (2.0 - l * r)                         # Newton -> ~f32 accuracy
            acc_sc[:, col] = acc_sc[:, col] * r
        # Single lane-dense (d_model-wide) store for all heads.
        o_ref[0] = acc_sc[...].astype(o_ref.dtype)


def _flash_attention_call(args, in_specs, *, B, S, d_model, h, tq, tkv,
                          out_dtype, compute_dtype):
    d_k = d_model // h
    kernel = functools.partial(_flash_mha_kernel, h=h, d_k=d_k,
                               compute_dtype=compute_dtype)
    return pl.pallas_call(
        kernel,
        out_shape=jax.ShapeDtypeStruct((B, S, d_model), out_dtype),
        grid_spec=pltpu.PrefetchScalarGridSpec(
            num_scalar_prefetch=0,
            grid=(B, S // tq, S // tkv),
            in_specs=in_specs,
            out_specs=pl.BlockSpec((1, tq, d_model),
                                   lambda b, qi, ki: (b, qi, 0)),
            scratch_shapes=[
                pltpu.VMEM((h, tq, 128), jnp.float32),    # running max m (lane-bcast)
                pltpu.VMEM((h, tq, 128), jnp.float32),    # running sum l (lane-bcast)
                pltpu.VMEM((tq, d_model), jnp.float32),   # unnormalized output acc
            ],
        ),
        compiler_params=pltpu.CompilerParams(
            dimension_semantics=("parallel", "parallel", "arbitrary"),
            vmem_limit_bytes=_vmem_limit_bytes(),
        ),
    )(*args)


def pallas_flash_attention(q, k, v, h, *, compute_dtype=None, out_dtype=None):
    """q/k/v: (B, S, d_model) in projection (head-major-column) layout."""
    B, S, d_model = q.shape
    compute_dtype = compute_dtype if compute_dtype is not None else q.dtype
    out_dtype = out_dtype if out_dtype is not None else q.dtype
    tq = _pick_tile(S, (512, 256, 128))
    tkv = _pick_tile(S, (1024, 512, 256, 128))
    in_specs = [
        pl.BlockSpec((1, tq, d_model), lambda b, qi, ki: (b, qi, 0)),
        pl.BlockSpec((1, tkv, d_model), lambda b, qi, ki: (b, ki, 0)),
        pl.BlockSpec((1, tkv, d_model), lambda b, qi, ki: (b, ki, 0)),
    ]
    return _flash_attention_call(
        (q, k, v), in_specs, B=B, S=S, d_model=d_model, h=h, tq=tq, tkv=tkv,
        out_dtype=out_dtype, compute_dtype=compute_dtype)


def pallas_flash_attention_fused_qkv(qkv, h, *, compute_dtype=None, out_dtype=None):
    """qkv: (B, S, 3*d_model) with columns [Q | K | V] straight from the fused
    QKV projection, consumed in place via three column-block BlockSpecs
    (requires d_model % 128 == 0 for lane-aligned column blocks)."""
    B, S, three_d = qkv.shape
    d_model = three_d // 3
    assert d_model % 128 == 0
    compute_dtype = compute_dtype if compute_dtype is not None else qkv.dtype
    out_dtype = out_dtype if out_dtype is not None else qkv.dtype
    tq = _pick_tile(S, (512, 256, 128))
    tkv = _pick_tile(S, (1024, 512, 256, 128))
    in_specs = [
        pl.BlockSpec((1, tq, d_model), lambda b, qi, ki: (b, qi, 0)),   # Q cols
        pl.BlockSpec((1, tkv, d_model), lambda b, qi, ki: (b, ki, 1)),  # K cols
        pl.BlockSpec((1, tkv, d_model), lambda b, qi, ki: (b, ki, 2)),  # V cols
    ]
    return _flash_attention_call(
        (qkv, qkv, qkv), in_specs, B=B, S=S, d_model=d_model, h=h, tq=tq,
        tkv=tkv, out_dtype=out_dtype, compute_dtype=compute_dtype)


# ----------------------------------------------------------------------------
# MultiHeadAttention forward (glue in plain JAX is only free reshapes)
# ----------------------------------------------------------------------------
def multi_head_attention(kparams, query, key, value, h, *, compute_dtype=None):
    """query/key/value: (B, S, d_model).  Returns (B, S, d_model)."""
    B, S, d_model = query.shape
    act_dtype = compute_dtype if compute_dtype is not None else query.dtype
    out_dtype = query.dtype

    if (query is key) and (key is value):
        # Self-attention: fused QKV projection, x read once.
        qkv = pallas_linear(query.reshape(B * S, d_model),
                            kparams["w_qkv_t"], kparams["b_qkv"],
                            compute_dtype=act_dtype, out_dtype=act_dtype)
        if d_model % 128 == 0:
            # Consume the fused projection output in place (no slicing/copy).
            x = pallas_flash_attention_fused_qkv(
                qkv.reshape(B, S, 3 * d_model), h,
                compute_dtype=act_dtype, out_dtype=act_dtype)
        else:
            # Small / unaligned d_model: cheap column slices, still no transpose.
            q2 = qkv[:, :d_model].reshape(B, S, d_model)
            k2 = qkv[:, d_model:2 * d_model].reshape(B, S, d_model)
            v2 = qkv[:, 2 * d_model:].reshape(B, S, d_model)
            x = pallas_flash_attention(q2, k2, v2, h,
                                       compute_dtype=act_dtype, out_dtype=act_dtype)
    else:
        def proj(xin, w_t, b):
            return pallas_linear(xin.reshape(B * S, d_model), w_t, b,
                                 compute_dtype=act_dtype,
                                 out_dtype=act_dtype).reshape(B, S, d_model)
        q2 = proj(query, kparams["wq_t"], kparams["bq"])
        k2 = proj(key, kparams["wk_t"], kparams["bk"])
        v2 = proj(value, kparams["wv_t"], kparams["bv"])
        x = pallas_flash_attention(q2, k2, v2, h,
                                   compute_dtype=act_dtype, out_dtype=act_dtype)

    # Output projection — the attention output is already in (B, S, d_model)
    # layout, so only a free reshape is needed (no transpose).
    out = pallas_linear(x.reshape(B * S, d_model), kparams["wo_t"], kparams["bo"],
                        compute_dtype=act_dtype, out_dtype=out_dtype)
    return out.reshape(B, S, d_model)


# ----------------------------------------------------------------------------
# Parameters + pure-JAX reference (mirrors the PyTorch module math)
# ----------------------------------------------------------------------------
def init_params(key, d_model):
    """PyTorch nn.Linear-style params: W (out,in), b (out,), y = x @ W^T + b.

    The module's clones() makes the four linears start identical; here each is
    initialized independently (more discriminative test, same forward math).
    """
    bound = 1.0 / math.sqrt(d_model)
    keys = jax.random.split(key, 8)

    def lin_init(kw, kb):
        w = jax.random.uniform(kw, (d_model, d_model), jnp.float32, -bound, bound)
        b = jax.random.uniform(kb, (d_model,), jnp.float32, -bound, bound)
        return w, b

    wq, bq = lin_init(keys[0], keys[1])
    wk, bk = lin_init(keys[2], keys[3])
    wv, bv = lin_init(keys[4], keys[5])
    wo, bo = lin_init(keys[6], keys[7])
    return dict(wq=wq, bq=bq, wk=wk, bk=bk, wv=wv, bv=bv, wo=wo, bo=bo)


def prepare_mha_params(params, h, compute_dtype=None):
    """Kernel-ready params: transposed weights, 1/sqrt(d_k) folded into Wq/bq,
    fused QKV weight, and (optionally) weights pre-cast to the MXU dtype."""
    d_model = params["wq"].shape[0]
    d_k = d_model // h
    scale = 1.0 / math.sqrt(d_k)
    wdt = compute_dtype if compute_dtype is not None else params["wq"].dtype

    wq_t = (params["wq"].T * scale).astype(wdt)   # scale folded into Q weights
    wk_t = params["wk"].T.astype(wdt)
    wv_t = params["wv"].T.astype(wdt)
    wo_t = params["wo"].T.astype(wdt)
    bq = (params["bq"] * scale).astype(jnp.float32)
    bk = params["bk"].astype(jnp.float32)
    bv = params["bv"].astype(jnp.float32)
    bo = params["bo"].astype(jnp.float32)

    return dict(
        wq_t=wq_t, bq=bq, wk_t=wk_t, bk=bk, wv_t=wv_t, bv=bv, wo_t=wo_t, bo=bo,
        w_qkv_t=jnp.concatenate([wq_t, wk_t, wv_t], axis=1),
        b_qkv=jnp.concatenate([bq, bk, bv], axis=0),
    )


def reference_mha(params, query, key, value, h):
    """Pure-JAX mirror of the PyTorch module forward (eval mode, no mask)."""
    B, S, d_model = query.shape
    d_k = d_model // h

    def lin(x, w, b):
        return x @ w.T + b

    def split(x):
        return x.reshape(B, S, h, d_k).transpose(0, 2, 1, 3)

    q = split(lin(query, params["wq"], params["bq"]))
    k = split(lin(key, params["wk"], params["bk"]))
    v = split(lin(value, params["wv"], params["bv"]))
    scores = jnp.einsum("bhqd,bhkd->bhqk", q, k) / math.sqrt(d_k)
    p = jax.nn.softmax(scores, axis=-1)
    x = jnp.einsum("bhqk,bhkd->bhqd", p, v)
    x = x.transpose(0, 2, 1, 3).reshape(B, S, d_model)
    return lin(x, params["wo"], params["bo"])


if __name__ == "__main__":
    root = jax.random.PRNGKey(0)
    key_a, key_b, key_c = jax.random.split(root, 3)

    # --- Config A: small shapes per the module spec (primary check), f32,
    #     self-attention (fused QKV projection + sliced-q/k/v attention path).
    B, S, d_model, h = 2, 8, 32, 4
    kp, kx = jax.random.split(key_a)
    raw_a = init_params(kp, d_model)
    prm_a = prepare_mha_params(raw_a, h)
    x_a = jax.random.normal(kx, (B, S, d_model), jnp.float32)
    out_a = jax.block_until_ready(multi_head_attention(prm_a, x_a, x_a, x_a, h))
    ref_a = reference_mha(raw_a, x_a, x_a, x_a, h)
    np.testing.assert_allclose(np.asarray(out_a), np.asarray(ref_a),
                               rtol=2e-4, atol=1e-4)

    # --- Config B: larger cross-attention; multi-tile grids + multi-block
    #     online softmax; f32 operands so the logic is validated tightly.
    B, S, d_model, h = 1, 384, 128, 2
    kp, kq, kk, kv = jax.random.split(key_b, 4)
    raw_b = init_params(kp, d_model)
    prm_b = prepare_mha_params(raw_b, h)
    q_in = jax.random.normal(kq, (B, S, d_model), jnp.float32)
    k_in = jax.random.normal(kk, (B, S, d_model), jnp.float32)
    v_in = jax.random.normal(kv, (B, S, d_model), jnp.float32)
    out_b = jax.block_until_ready(multi_head_attention(prm_b, q_in, k_in, v_in, h))
    ref_b = reference_mha(raw_b, q_in, k_in, v_in, h)
    np.testing.assert_allclose(np.asarray(out_b), np.asarray(ref_b),
                               rtol=2e-4, atol=1e-4)

    # --- Config C: self-attention with d_model % 128 == 0 -> fused-QKV
    #     column-block attention path, bf16 MXU operands (f32 accumulation).
    B, S, d_model, h = 2, 256, 128, 4
    kp, kx = jax.random.split(key_c)
    raw_c = init_params(kp, d_model)
    prm_c = prepare_mha_params(raw_c, h, compute_dtype=jnp.bfloat16)
    x_c = jax.random.normal(kx, (B, S, d_model), jnp.float32)
    out_c = jax.block_until_ready(
        multi_head_attention(prm_c, x_c, x_c, x_c, h, compute_dtype=jnp.bfloat16))
    ref_c = reference_mha(raw_c, x_c, x_c, x_c, h)
    np.testing.assert_allclose(np.asarray(out_c), np.asarray(ref_c),
                               rtol=3e-2, atol=3e-2)

    print("KERNEL_OK")
</pallas_src>

<mosaic_0001>
module attributes {stable_mosaic.version = 11 : i64} {
  func.func @_linear_kernel(%arg0: i32, %arg1: i32, %arg2: i32, %arg3: memref<16x32xf32, #tpu.memory_space<vmem>>, %arg4: memref<32x96xf32, #tpu.memory_space<vmem>>, %arg5: memref<1x96xf32, #tpu.memory_space<vmem>>, %arg6: memref<16x96xf32, #tpu.memory_space<vmem>>, %arg7: memref<16x96xf32, #tpu.memory_space<vmem>>) attributes {dimension_semantics = [#tpu.dimension_semantics<parallel>, #tpu.dimension_semantics<parallel>, #tpu.dimension_semantics<arbitrary>], iteration_bounds = array<i64: 1, 1, 1>, scalar_prefetch = 0 : i64, scratch_operands = 1 : i64, tpu.core_type = #tpu.core_type<tc>, window_params = [{transform_indices = @transform_0, window_bounds = array<i64: 16, 32>}, {transform_indices = @transform_1, window_bounds = array<i64: 32, 96>}, {transform_indices = @transform_2, window_bounds = array<i64: 1, 96>}, {transform_indices = @transform_3, window_bounds = array<i64: 16, 96>}]} {
    %c0_i32 = arith.constant 0 : i32
    %0 = arith.cmpi eq, %arg2, %c0_i32 : i32
    %1 = arith.extui %0 : i1 to i32
    %c0_i32_0 = arith.constant 0 : i32
    %2 = arith.cmpi ne, %1, %c0_i32_0 : i32
    scf.if %2 {
      %cst_10 = arith.constant 0.000000e+00 : f32
      %12 = vector.broadcast %cst_10 : f32 to vector<16x96xf32>
      %c0_11 = arith.constant 0 : index
      %c0_12 = arith.constant 0 : index
      %13 = vector.load %arg7[%c0_11, %c0_12] : memref<16x96xf32, #tpu.memory_space<vmem>>, vector<16x96xf32>
      tpu.vector_store %arg7[%c0_11, %c0_12], %12 {strides = array<i32>} : memref<16x96xf32, #tpu.memory_space<vmem>>, vector<16x96xf32>,
    } else {
    }
    %c0 = arith.constant 0 : index
    %c0_1 = arith.constant 0 : index
    %3 = vector.load %arg7[%c0, %c0_1] : memref<16x96xf32, #tpu.memory_space<vmem>>, vector<16x96xf32>
    %c0_2 = arith.constant 0 : index
    %c0_3 = arith.constant 0 : index
    %4 = vector.load %arg3[%c0_2, %c0_3] : memref<16x32xf32, #tpu.memory_space<vmem>>, vector<16x32xf32>
    %c0_4 = arith.constant 0 : index
    %c0_5 = arith.constant 0 : index
    %5 = vector.load %arg4[%c0_4, %c0_5] : memref<32x96xf32, #tpu.memory_space<vmem>>, vector<32x96xf32>
    %cst = arith.constant dense<0.000000e+00> : vector<16x96xf32>
    %6 = tpu.matmul %4, %5, %cst {dimension_numbers = #tpu.dot_dimension_numbers<[1], [0], [0], [1], [0, 0, 1, 1], [], []>} : vector<16x32xf32>, vector<32x96xf32>, vector<16x96xf32> -> vector<16x96xf32>
    %7 = arith.addf %3, %6 : vector<16x96xf32>
    %c0_6 = arith.constant 0 : index
    %c0_7 = arith.constant 0 : index
    %8 = vector.load %arg7[%c0_6, %c0_7] : memref<16x96xf32, #tpu.memory_space<vmem>>, vector<16x96xf32>
    tpu.vector_store %arg7[%c0_6, %c0_7], %7 {strides = array<i32>} : memref<16x96xf32, #tpu.memory_space<vmem>>, vector<16x96xf32>,
    %c0_i32_8 = arith.constant 0 : i32
    %9 = arith.cmpi eq, %arg2, %c0_i32_8 : i32
    %10 = arith.extui %9 : i1 to i32
    %c0_i32_9 = arith.constant 0 : i32
    %11 = arith.cmpi ne, %10, %c0_i32_9 : i32
    scf.if %11 {
      %c0_10 = arith.constant 0 : index
      %c0_11 = arith.constant 0 : index
      %12 = vector.load %arg7[%c0_10, %c0_11] : memref<16x96xf32, #tpu.memory_space<vmem>>, vector<16x96xf32>
      %c0_12 = arith.constant 0 : index
      %c0_13 = arith.constant 0 : index
      %13 = vector.load %arg5[%c0_12, %c0_13] : memref<1x96xf32, #tpu.memory_space<vmem>>, vector<1x96xf32>
      %14 = vector.broadcast %13 : vector<1x96xf32> to vector<16x96xf32>
      %15 = arith.addf %12, %14 : vector<16x96xf32>
      %c0_14 = arith.constant 0 : index
      %c0_15 = arith.constant 0 : index
      %16 = vector.load %arg6[%c0_14, %c0_15] : memref<16x96xf32, #tpu.memory_space<vmem>>, vector<16x96xf32>
      tpu.vector_store %arg6[%c0_14, %c0_15], %15 {strides = array<i32>} : memref<16x96xf32, #tpu.memory_space<vmem>>, vector<16x96xf32>,
    } else {
    }
    return
  }
  func.func @transform_0(%arg0: i32, %arg1: i32, %arg2: i32) -> (i32, i32) {
    %c0_i32 = arith.constant 0 : i32
    return %arg0, %arg2 : i32, i32
  }
  func.func @transform_1(%arg0: i32, %arg1: i32, %arg2: i32) -> (i32, i32) {
    %c0_i32 = arith.constant 0 : i32
    return %arg2, %arg1 : i32, i32
  }
  func.func @transform_2(%arg0: i32, %arg1: i32, %arg2: i32) -> (i32, i32) {
    %c0_i32 = arith.constant 0 : i32
    %c0_i32_0 = arith.constant 0 : i32
    return %c0_i32, %arg1 : i32, i32
  }
  func.func @transform_3(%arg0: i32, %arg1: i32, %arg2: i32) -> (i32, i32) {
    %c0_i32 = arith.constant 0 : i32
    return %arg0, %arg1 : i32, i32
  }
}

</mosaic_0001>

<bundles_post_ra>
// kernel: tpu_custom_call.1
= control target key start
LH: loop header
LB: loop body
LE: loop exit
PB: predicated region body
PF: predicated region fallthrough
CT: control target
= control target key end

     0   :  { %8 = vsyncpa [#allocation4], 0  ;;  %s274_s0 = inlined_call_operand.hbm [shape: f32[16,32], index: 0, kind: input, shape index: {}]   ;;  %s275_s1 = inlined_call_operand.hbm [shape: f32[32,96], index: 1, kind: input, shape index: {}]   ;;  %s276_s2 = inlined_call_operand.vmem [shape: f32[1,96], index: 2, kind: input, shape index: {}]   ;;  %s277_s3 = inlined_call_operand.hbm [shape: f32[16,96], index: 3, kind: output, shape index: {}]  }
   0x1   :  { %9 = vsyncpa [#allocation7], 0 }
   0x2   :  { %10 = vsyncpa [#allocation5], 0  ;;  %s15_s14 = sshll.u32 %s274_s0, 4  ;;  %s221_s15 = smov [#allocation3]   ;;  %s16_s14 = int_to_ptr.hbm [resolvable:$true] %s15_s14 }
   0x3   :  { %s17_s16 = sshll.u32 %s221_s15, 4  ;;  %s28_s19 = sshll.u32 %s275_s1, 4  ;;  %s18_s16 = int_to_ptr.vmem [resolvable:$true] %s17_s16  ;;  %s29_s19 = int_to_ptr.hbm [resolvable:$true] %s28_s19 }
   0x4   :  { %s222_s20 = smov 128   ;;  %s223_s21 = smov 8  }
   0x5   :  { %23 = dma.hbm_to_vmem [thread:$0]  %s16_s14, 256, %s18_s16, [#allocation4], %s222_s20, %s222_s20, %s223_s21  }
   0x6   :  { %s224_s22 = smov [#allocation6]  }
   0x7   :  { %s30_s23 = sshll.u32 %s224_s22, 4  ;;  %s31_s23 = int_to_ptr.vmem [resolvable:$true] %s30_s23 }
   0x8   :  { %36 = dma.hbm_to_vmem [thread:$0]  %s29_s19, 512, %s31_s23, [#allocation7], %s222_s20, %s222_s20, %s223_s21  }
   0x9   :  { %215 = dma.done.wait [#allocation4], 256  }
   0xa   :  { %216 = vsyncadd [#allocation4], 4294967040 }
   0xb   :  { %217 = dma.done.wait [#allocation7], 512  }
   0xc   :  { %218 = vsyncadd [#allocation7], 4294966784  ;;  %vm51_vm0 = vcmask 785408   ;;  %v225_v0 = vmov 0.0   ;;  %v61_v1 = vld [vmem:[#allocation6 + $0x18] sm:$0xff]  ;;  %v60_v2 = vld [vmem:[#allocation6 + $0x10] sm:$0xff] }
   0xd   :  { %52 = vst.msk [vmem:[#allocation2] sm:$0xff] %vm51_vm0, %v225_v0  ;;  %81 = vmatpush.msra.mxu0 %v61_v1  ;;  %132 = vmatpush.msra.mxu1 %v61_v1  ;;  %v59_v3 = vld [vmem:[#allocation6 + $0x8] sm:$0xff]  ;;  %v58_v4 = vld [vmem:[#allocation6] sm:$0xff]  ;;  %v56_v5 = vld [vmem:[#allocation3] sm:$0xff]  ;;  %vm62_vm1 = vcmask 261120   ;;  %s226_s24 = smov [#allocation8]  }
   0xe   :  { %53 = vst.msk [vmem:[#allocation2 + $0x8] sm:$0xff] %vm51_vm0, %v225_v0  ;;  %v57_v6 = vld [vmem:[#allocation3 + $0x8] sm:$0xff]  ;;  %v142_v13 = vld [vmem:[%s276_s2] ss:$0 sm:$0xff]  ;;  %s114_s25 = sshll.u32 %s226_s24, 4  ;;  %s116_s28 = sshll.u32 %s277_s3, 4  ;;  %s115_s25 = int_to_ptr.vmem [resolvable:$true] %s114_s25  ;;  %s117_s28 = int_to_ptr.hbm [resolvable:$true] %s116_s28 }
   0xf   :  { %82 = vmatpush.msra.mxu0 %v60_v2  ;;  %133 = vmatpush.msra.mxu1 %v60_v2 }
  0x11   :  { %83 = vmatpush.msra.mxu0 %v59_v3  ;;  %134 = vmatpush.msra.mxu1 %v59_v3 }
  0x13   :  { %84 = vmatpush.msra.mxu0 %v58_v4  ;;  %135 = vmatpush.msra.mxu1 %v58_v4 }
  0x14   :  { %130 = vmatmul.msk.f32.vlgmr.msra.gmra.mxu0 %vm62_vm1, %v56_v5  ;;  %131 = vmatmul.msk.f32.vlgmr.msra.gmra.mxu1 %vm62_vm1, %v57_v6  ;;  %v54_v7 = vld [vmem:[#allocation2] sm:$0xff] }
  0x15   :  { %v55_v8 = vld [vmem:[#allocation2 + $0x8] sm:$0xff] }
  0x91   :  { %v86_v9 = vpop.f32.mrf.mxu0  ;;  %v89_v10 = vpop.f32.mrf.mxu1 }
  0x92   :  { %v92_v11 = vadd.f32 %v86_v9, %v54_v7  ;;  %v93_v12 = vadd.f32 %v89_v10, %v55_v8 }
  0x94   :  { %95 = vst.msk [vmem:[#allocation2] sm:$0xff] %vm51_vm0, %v92_v11 }
  0x95   :  { %96 = vst.msk [vmem:[#allocation2 + $0x8] sm:$0xff] %vm51_vm0, %v93_v12 }
  0x9b   :  { %v100_v14 = vld [vmem:[#allocation2] sm:$0xff] }
  0x9c   :  { %v101_v15 = vld [vmem:[#allocation2 + $0x8] sm:$0xff]  ;;  %v106_v16 = vadd.f32 %v142_v13, %v100_v14 }
  0x9d   :  { %v107_v17 = vadd.f32 %v142_v13, %v101_v15 }
  0x9e   :  { %108 = vst.msk [vmem:[#allocation8] sm:$0xff] %vm51_vm0, %v106_v16 }
  0x9f   :  { %109 = vst.msk [vmem:[#allocation8 + $0x8] sm:$0xff] %vm51_vm0, %v107_v17 }
  0xa0   :  { %122 = dma.vmem_to_hbm [thread:$0]  %s115_s25, 256, %s117_s28, [#allocation5], %s222_s20, %s222_s20, %s223_s21  }
  0xa1   :  { %219 = dma.done.wait [#allocation5], 256  }
  0xa2   :  { %220 = vsyncadd [#allocation5], 4294967040 }
  0xa3   :  { %127 = vsyncpa [#allocation4], 1 }
  0xa4   :  { %128 = vsyncpa [#allocation7], 1 }
  0xa5   :  { %129 = vsyncpa [#allocation5], 1 }

</bundles_post_ra>
